<compile_context>
chip_gen: v7x
topology: tpu7x:2x2x1
jax: 0.10.0
libtpu: 0.0.40
codegen_flags: <defaults>
</compile_context>

<pallas_src>
import functools
import math

import numpy as np
import jax
import jax.numpy as jnp
from jax.experimental import pallas as pl
from jax.experimental.pallas import tpu as pltpu


def _vmem_limit_bytes():
    """Generation-aware scoped-VMEM budget (v5e/v6e: 128 MiB, v7x: 64 MiB)."""
    try:
        cap = int(pltpu.get_tpu_info().vmem_capacity_bytes)
    except Exception:
        cap = 64 * 1024 * 1024        # conservative fallback, fits every generation
    return min((cap * 3) // 4, 96 * 1024 * 1024)


def _pick_tile(dim, target, align, name="dim"):
    """Largest `align`-aligned divisor of `dim` that is <= target; `dim` itself
    if dim <= target.  Fails loudly (instead of silently returning a huge block)
    when no aligned tiling exists."""
    if dim <= target:
        return dim
    t = (target // align) * align
    while t >= align:
        if dim % t == 0:
            return t
        t -= align
    # TODO(synk): pad inputs to a tile multiple instead of failing for ragged shapes.
    raise ValueError(f"{name}={dim} has no {align}-aligned tile <= {target}; pad the input.")


# ---------------------------------------------------------------------------
# Tiled linear kernel:  y = x @ W + b      (W stored as (d_in, d_out))
# ---------------------------------------------------------------------------

def _linear_kernel(x_ref, w_ref, b_ref, o_ref, acc_ref):
    k = pl.program_id(2)

    @pl.when(k == 0)
    def _():
        acc_ref[...] = jnp.zeros_like(acc_ref)

    acc_ref[...] += jnp.dot(x_ref[...], w_ref[...],
                            preferred_element_type=jnp.float32)

    @pl.when(k == pl.num_programs(2) - 1)
    def _():
        o_ref[...] = (acc_ref[...] + b_ref[...]).astype(o_ref.dtype)


def linear_pallas(x2d, w, b, *, compute_dtype, out_dtype, vmem_limit,
                  tm=512, tn=512, tk=512):
    """x2d: (M, d_in), w: (d_in, d_out), b: (d_out,) -> (M, d_out)."""
    M, d_in = x2d.shape
    d_out = w.shape[1]

    x2d = x2d.astype(compute_dtype)                 # bf16 halves HBM/VMEM traffic
    w = w.astype(compute_dtype)
    b2d = b.reshape(1, d_out).astype(jnp.float32)   # bias added in f32

    sub = 16 if np.dtype(compute_dtype).itemsize == 2 else 8
    tm = _pick_tile(M, tm, sub, "M")
    tn = _pick_tile(d_out, tn, 128, "d_out")
    tk = _pick_tile(d_in, tk, 128, "d_in")
    grid = (M // tm, d_out // tn, d_in // tk)

    return pl.pallas_call(
        _linear_kernel,
        out_shape=jax.ShapeDtypeStruct((M, d_out), out_dtype),
        grid_spec=pltpu.PrefetchScalarGridSpec(
            num_scalar_prefetch=0,
            grid=grid,
            in_specs=[
                pl.BlockSpec((tm, tk), lambda i, j, k: (i, k)),
                pl.BlockSpec((tk, tn), lambda i, j, k: (k, j)),
                pl.BlockSpec((1, tn), lambda i, j, k: (0, j)),
            ],
            out_specs=pl.BlockSpec((tm, tn), lambda i, j, k: (i, j)),
            scratch_shapes=[pltpu.VMEM((tm, tn), jnp.float32)],
        ),
        compiler_params=pltpu.CompilerParams(
            dimension_semantics=("parallel", "parallel", "arbitrary"),
            vmem_limit_bytes=vmem_limit,
        ),
    )(x2d, w, b2d)


# ---------------------------------------------------------------------------
# Flash attention over (B, S, d_model) activations; heads are sliced inside the
# kernel (no head-split transpose); W_o is VMEM-resident and fused in the
# epilogue as one full-depth matmul.
#   q, k, v : (B, S, d_model)   w_o : (d_model, d_model)   b_o : (1, d_model)
#   -> (B, S, d_model)
# ---------------------------------------------------------------------------

def _mha_flash_kernel(q_ref, k_ref, v_ref, wo_ref, bo_ref, o_ref,
                      m_sc, l_sc, acc_sc, *, num_heads, d_k, approx_recip):
    kv = pl.program_id(2)

    @pl.when(kv == 0)
    def _():
        m_sc[...] = jnp.full_like(m_sc, -jnp.inf)
        l_sc[...] = jnp.zeros_like(l_sc)
        acc_sc[...] = jnp.zeros_like(acc_sc)

    q = q_ref[...]          # (tq,  d_model) — 1/sqrt(d_k) already folded into W_q/b_q
    k = k_ref[...]          # (tkv, d_model)
    v = v_ref[...]          # (tkv, d_model)

    nt_dims = (((1,), (1,)), ((), ()))           # contract last dims: q_h @ k_h^T
    for h in range(num_heads):                   # static, unrolled head loop
        sl = slice(h * d_k, (h + 1) * d_k)
        s = jax.lax.dot_general(q[:, sl], k[:, sl], nt_dims,
                                preferred_element_type=jnp.float32)   # (tq, tkv)
        m_prev = m_sc[h]                                              # (tq, 1)
        m_new = jnp.maximum(m_prev, jnp.max(s, axis=-1, keepdims=True))
        alpha = jnp.exp(m_prev - m_new)
        p = jnp.exp(s - m_new)
        l_sc[h] = alpha * l_sc[h] + jnp.sum(p, axis=-1, keepdims=True)
        acc_sc[h] = alpha * acc_sc[h] + jnp.dot(
            p.astype(v.dtype), v[:, sl], preferred_element_type=jnp.float32)
        m_sc[h] = m_new

    # Epilogue: normalize each head, concatenate along features (this IS the
    # combine_heads layout) and apply the output projection as one full-depth
    # matmul against the VMEM-resident W_o; lane-dense (tq, d_model) store.
    @pl.when(kv == pl.num_programs(2) - 1)
    def _():
        parts = []
        for h in range(num_heads):
            inv_l = pl.reciprocal(l_sc[h], approx=approx_recip)
            parts.append(acc_sc[h] * inv_l)
        attn = jnp.concatenate(parts, axis=-1).astype(wo_ref.dtype)   # (tq, d_model)
        out = jnp.dot(attn, wo_ref[...], preferred_element_type=jnp.float32)
        o_ref[...] = (out + bo_ref[...]).astype(o_ref.dtype)


def flash_mha_out_proj(q, k, v, w_o, b_o, *, num_heads, out_dtype,
                       approx_recip, vmem_limit):
    B, S, d_model = q.shape
    d_k = d_model // num_heads
    in_b = np.dtype(q.dtype).itemsize
    out_b = np.dtype(out_dtype).itemsize
    sub = 16 if in_b == 2 else 8

    def footprint(tq, tkv):                        # per-step VMEM estimate (bytes)
        return (2 * tq * d_model * in_b            # q tile (double-buffered)
                + 2 * 2 * tkv * d_model * in_b     # k, v tiles
                + 2 * d_model * d_model * in_b     # resident W_o
                + 2 * tq * d_model * out_b         # output block
                + num_heads * tq * (d_k + 2) * 4   # f32 scratch (acc, m, l)
                + 8 * 1024)

    tq = _pick_tile(S, 512 if vmem_limit >= (64 << 20) else 256, sub, "S")
    tkv = _pick_tile(S, 512, sub, "S")
    budget = (vmem_limit * 9) // 10
    while footprint(tq, tkv) > budget and tkv > sub:
        tkv = _pick_tile(S, max(tkv // 2, sub), sub, "S")
    while footprint(tq, tkv) > budget and tq > sub:
        tq = _pick_tile(S, max(tq // 2, sub), sub, "S")
    if footprint(tq, tkv) > budget:
        # TODO(synk): stream W_o per head instead of keeping it VMEM-resident
        # for very large d_model on v7x (64 MiB VMEM per TensorCore).
        raise ValueError("attention tiles + resident W_o do not fit in VMEM")

    # B * (S // tq) >= 2 keeps both v7x TensorCores busy via the parallel axes.
    grid = (B, S // tq, S // tkv)

    kernel = functools.partial(_mha_flash_kernel, num_heads=num_heads,
                               d_k=d_k, approx_recip=approx_recip)
    return pl.pallas_call(
        kernel,
        out_shape=jax.ShapeDtypeStruct((B, S, d_model), out_dtype),
        grid_spec=pltpu.PrefetchScalarGridSpec(
            num_scalar_prefetch=0,
            grid=grid,
            in_specs=[
                pl.BlockSpec((pl.Squeezed(), tq, d_model),
                             lambda b, i, j: (b, i, 0)),
                pl.BlockSpec((pl.Squeezed(), tkv, d_model),
                             lambda b, i, j: (b, j, 0)),
                pl.BlockSpec((pl.Squeezed(), tkv, d_model),
                             lambda b, i, j: (b, j, 0)),
                pl.BlockSpec((d_model, d_model), lambda b, i, j: (0, 0)),  # resident
                pl.BlockSpec((1, d_model), lambda b, i, j: (0, 0)),
            ],
            out_specs=pl.BlockSpec((pl.Squeezed(), tq, d_model),
                                   lambda b, i, j: (b, i, 0)),
            scratch_shapes=[
                pltpu.VMEM((num_heads, tq, 1), jnp.float32),     # running max m
                pltpu.VMEM((num_heads, tq, 1), jnp.float32),     # running denom l
                pltpu.VMEM((num_heads, tq, d_k), jnp.float32),   # unnormalized acc
            ],
        ),
        compiler_params=pltpu.CompilerParams(
            dimension_semantics=("parallel", "parallel", "arbitrary"),
            vmem_limit_bytes=vmem_limit,
        ),
    )(q, k, v, w_o, b_o)


# ---------------------------------------------------------------------------
# MultiHeadAttention forward (matches the PyTorch module semantics, mask=None)
# ---------------------------------------------------------------------------

def init_mha_params(key, d_model):
    """Deterministic init mimicking nn.Linear default (uniform +-1/sqrt(fan_in))."""
    bound = 1.0 / math.sqrt(d_model)
    keys = jax.random.split(key, 8)
    params = {}
    for i, name in enumerate(["q", "k", "v", "o"]):
        # PyTorch Linear weight is (out, in); stored transposed (in, out) for x @ W.
        w = jax.random.uniform(keys[2 * i], (d_model, d_model),
                               jnp.float32, -bound, bound)
        b = jax.random.uniform(keys[2 * i + 1], (d_model,),
                               jnp.float32, -bound, bound)
        params[f"W_{name}"] = w
        params[f"b_{name}"] = b
    return params


def multi_head_attention(params, Q, K, V, num_heads, *, compute_dtype=None):
    # TODO(synk): optional attention mask (mask != None path) not implemented.
    B, S, d_model = Q.shape
    assert d_model % num_heads == 0, "d_model must be divisible by num_heads"
    d_k = d_model // num_heads
    out_dtype = Q.dtype
    cdt = np.dtype(compute_dtype) if compute_dtype is not None else np.dtype(Q.dtype)
    vmem_limit = _vmem_limit_bytes()
    scale = 1.0 / math.sqrt(d_k)

    def proj(x, w, b):
        y = linear_pallas(x.reshape(B * S, d_model), w, b,
                          compute_dtype=cdt, out_dtype=cdt,
                          vmem_limit=vmem_limit)
        return y.reshape(B, S, d_model)     # free reshape — no transposes anywhere

    # Fold 1/sqrt(d_k) into the Q projection weights (free at trace time).
    qh = proj(Q, params["W_q"] * scale, params["b_q"] * scale)
    kh = proj(K, params["W_k"], params["b_k"])
    vh = proj(V, params["W_v"], params["b_v"])

    w_o = params["W_o"].astype(cdt)                              # (d_model, d_model)
    b_o = params["b_o"].astype(jnp.float32).reshape(1, d_model)

    return flash_mha_out_proj(qh, kh, vh, w_o, b_o,
                              num_heads=num_heads, out_dtype=out_dtype,
                              approx_recip=(cdt.itemsize == 2),   # exact recip for f32
                              vmem_limit=vmem_limit)


# ---------------------------------------------------------------------------
# Reference (pure JAX) for a sanity check
# ---------------------------------------------------------------------------

def reference_mha(params, Q, K, V, num_heads):
    B, S, d_model = Q.shape
    d_k = d_model // num_heads

    def lin(x, w, b):
        return x @ w + b

    def split(x):
        return x.reshape(B, S, num_heads, d_k).transpose(0, 2, 1, 3)

    q = split(lin(Q, params["W_q"], params["b_q"]))
    k = split(lin(K, params["W_k"], params["b_k"]))
    v = split(lin(V, params["W_v"], params["b_v"]))
    s = jnp.einsum("bhqd,bhkd->bhqk", q, k) / math.sqrt(d_k)
    p = jax.nn.softmax(s, axis=-1)
    a = jnp.einsum("bhqk,bhkd->bhqd", p, v)
    c = a.transpose(0, 2, 1, 3).reshape(B, S, d_model)
    return lin(c, params["W_o"], params["b_o"])


# ---------------------------------------------------------------------------

if __name__ == "__main__":
    B, S, d_model, num_heads = 2, 8, 32, 4

    key = jax.random.PRNGKey(0)
    kp, kq, kk, kvk = jax.random.split(key, 4)
    params = init_mha_params(kp, d_model)

    Q = jax.random.normal(kq, (B, S, d_model), jnp.float32)
    K = jax.random.normal(kk, (B, S, d_model), jnp.float32)
    V = jax.random.normal(kvk, (B, S, d_model), jnp.float32)

    ref = reference_mha(params, Q, K, V, num_heads)

    # f32 path (exact reciprocal in the softmax normalization)
    out = multi_head_attention(params, Q, K, V, num_heads)
    out = jax.block_until_ready(out)
    assert out.shape == (B, S, d_model)
    assert jnp.allclose(out, ref, atol=2e-2, rtol=2e-2), "f32 mismatch vs reference"

    # bf16 MXU-feed path (f32 accumulation / f32 softmax statistics)
    out_bf16 = multi_head_attention(params, Q, K, V, num_heads,
                                    compute_dtype=jnp.bfloat16)
    out_bf16 = jax.block_until_ready(out_bf16)
    assert out_bf16.shape == (B, S, d_model)
    assert jnp.allclose(out_bf16.astype(jnp.float32), ref,
                        atol=2e-1, rtol=2e-1), "bf16 mismatch vs reference"

    print("KERNEL_OK")
</pallas_src>

<mosaic_0001>
module attributes {stable_mosaic.version = 11 : i64} {
  func.func @_linear_kernel(%arg0: i32, %arg1: i32, %arg2: i32, %arg3: memref<16x32xf32, #tpu.memory_space<vmem>>, %arg4: memref<32x32xf32, #tpu.memory_space<vmem>>, %arg5: memref<1x32xf32, #tpu.memory_space<vmem>>, %arg6: memref<16x32xf32, #tpu.memory_space<vmem>>, %arg7: memref<16x32xf32, #tpu.memory_space<vmem>>) attributes {dimension_semantics = [#tpu.dimension_semantics<parallel>, #tpu.dimension_semantics<parallel>, #tpu.dimension_semantics<arbitrary>], iteration_bounds = array<i64: 1, 1, 1>, scalar_prefetch = 0 : i64, scratch_operands = 1 : i64, tpu.core_type = #tpu.core_type<tc>, window_params = [{transform_indices = @transform_0, window_bounds = array<i64: 16, 32>}, {transform_indices = @transform_1, window_bounds = array<i64: 32, 32>}, {transform_indices = @transform_2, window_bounds = array<i64: 1, 32>}, {transform_indices = @transform_3, window_bounds = array<i64: 16, 32>}]} {
    %c0_i32 = arith.constant 0 : i32
    %0 = arith.cmpi eq, %arg2, %c0_i32 : i32
    %1 = arith.extui %0 : i1 to i32
    %c0_i32_0 = arith.constant 0 : i32
    %2 = arith.cmpi ne, %1, %c0_i32_0 : i32
    scf.if %2 {
      %cst_10 = arith.constant 0.000000e+00 : f32
      %12 = vector.broadcast %cst_10 : f32 to vector<16x32xf32>
      %c0_11 = arith.constant 0 : index
      %c0_12 = arith.constant 0 : index
      %13 = vector.load %arg7[%c0_11, %c0_12] : memref<16x32xf32, #tpu.memory_space<vmem>>, vector<16x32xf32>
      tpu.vector_store %arg7[%c0_11, %c0_12], %12 {strides = array<i32>} : memref<16x32xf32, #tpu.memory_space<vmem>>, vector<16x32xf32>,
    } else {
    }
    %c0 = arith.constant 0 : index
    %c0_1 = arith.constant 0 : index
    %3 = vector.load %arg7[%c0, %c0_1] : memref<16x32xf32, #tpu.memory_space<vmem>>, vector<16x32xf32>
    %c0_2 = arith.constant 0 : index
    %c0_3 = arith.constant 0 : index
    %4 = vector.load %arg3[%c0_2, %c0_3] : memref<16x32xf32, #tpu.memory_space<vmem>>, vector<16x32xf32>
    %c0_4 = arith.constant 0 : index
    %c0_5 = arith.constant 0 : index
    %5 = vector.load %arg4[%c0_4, %c0_5] : memref<32x32xf32, #tpu.memory_space<vmem>>, vector<32x32xf32>
    %cst = arith.constant dense<0.000000e+00> : vector<16x32xf32>
    %6 = tpu.matmul %4, %5, %cst {dimension_numbers = #tpu.dot_dimension_numbers<[1], [0], [0], [1], [0, 0, 1, 1], [], []>} : vector<16x32xf32>, vector<32x32xf32>, vector<16x32xf32> -> vector<16x32xf32>
    %7 = arith.addf %3, %6 : vector<16x32xf32>
    %c0_6 = arith.constant 0 : index
    %c0_7 = arith.constant 0 : index
    %8 = vector.load %arg7[%c0_6, %c0_7] : memref<16x32xf32, #tpu.memory_space<vmem>>, vector<16x32xf32>
    tpu.vector_store %arg7[%c0_6, %c0_7], %7 {strides = array<i32>} : memref<16x32xf32, #tpu.memory_space<vmem>>, vector<16x32xf32>,
    %c0_i32_8 = arith.constant 0 : i32
    %9 = arith.cmpi eq, %arg2, %c0_i32_8 : i32
    %10 = arith.extui %9 : i1 to i32
    %c0_i32_9 = arith.constant 0 : i32
    %11 = arith.cmpi ne, %10, %c0_i32_9 : i32
    scf.if %11 {
      %c0_10 = arith.constant 0 : index
      %c0_11 = arith.constant 0 : index
      %12 = vector.load %arg7[%c0_10, %c0_11] : memref<16x32xf32, #tpu.memory_space<vmem>>, vector<16x32xf32>
      %c0_12 = arith.constant 0 : index
      %c0_13 = arith.constant 0 : index
      %13 = vector.load %arg5[%c0_12, %c0_13] : memref<1x32xf32, #tpu.memory_space<vmem>>, vector<1x32xf32>
      %14 = vector.broadcast %13 : vector<1x32xf32> to vector<16x32xf32>
      %15 = arith.addf %12, %14 : vector<16x32xf32>
      %c0_14 = arith.constant 0 : index
      %c0_15 = arith.constant 0 : index
      %16 = vector.load %arg6[%c0_14, %c0_15] : memref<16x32xf32, #tpu.memory_space<vmem>>, vector<16x32xf32>
      tpu.vector_store %arg6[%c0_14, %c0_15], %15 {strides = array<i32>} : memref<16x32xf32, #tpu.memory_space<vmem>>, vector<16x32xf32>,
    } else {
    }
    return
  }
  func.func @transform_0(%arg0: i32, %arg1: i32, %arg2: i32) -> (i32, i32) {
    %c0_i32 = arith.constant 0 : i32
    return %arg0, %arg2 : i32, i32
  }
  func.func @transform_1(%arg0: i32, %arg1: i32, %arg2: i32) -> (i32, i32) {
    %c0_i32 = arith.constant 0 : i32
    return %arg2, %arg1 : i32, i32
  }
  func.func @transform_2(%arg0: i32, %arg1: i32, %arg2: i32) -> (i32, i32) {
    %c0_i32 = arith.constant 0 : i32
    %c0_i32_0 = arith.constant 0 : i32
    return %c0_i32, %arg1 : i32, i32
  }
  func.func @transform_3(%arg0: i32, %arg1: i32, %arg2: i32) -> (i32, i32) {
    %c0_i32 = arith.constant 0 : i32
    return %arg0, %arg1 : i32, i32
  }
}

</mosaic_0001>

<bundles_post_ra>
// kernel: tpu_custom_call.1
= control target key start
LH: loop header
LB: loop body
LE: loop exit
PB: predicated region body
PF: predicated region fallthrough
CT: control target
= control target key end

     0   :  { %8 = vsyncpa [#allocation4], 0  ;;  %s366_s0 = inlined_call_operand.hbm [shape: f32[16,32], index: 0, kind: input, shape index: {}]   ;;  %s367_s1 = inlined_call_operand.hbm [shape: f32[32,32], index: 1, kind: input, shape index: {}]   ;;  %s368_s2 = inlined_call_operand.vmem [shape: f32[1,32], index: 2, kind: input, shape index: {}]   ;;  %s369_s3 = inlined_call_operand.hbm [shape: f32[16,32], index: 3, kind: output, shape index: {}]  }
   0x1   :  { %9 = vsyncpa [#allocation7], 0 }
   0x2   :  { %10 = vsyncpa [#allocation5], 0  ;;  %s284_s12 = smov [#allocation3]   ;;  %s212_s16 = scalar_lea.hbm %s366_s0, 256 }
   0x3   :  { %s16_s13 = sshll.u32 %s284_s12, 4  ;;  %p213_p0 = scmp.ne.s32.totalorder %s366_s0, %s212_s16  ;;  %s17_s13 = int_to_ptr.vmem [resolvable:$true] %s16_s13 }
   0x4   :  { %p216_p1 = scmp.lt.u32.totalorder %s212_s16, %s366_s0 }
   0x6   :  { %p218_p2 = pnand %p216_p1, %p213_p0 }
   0x8   :  { %221 = shalt.err (!%p218_p2)
}
   0x9   :  { %s222_s21 = scalar_lea.vmem %s17_s13, 256  ;;  %p227_p4 = scmp.lt.s32.totalorder %s17_s13, %s17_s13 }
   0xa   :  { %p223_p3 = scmp.ne.s32.totalorder %s17_s13, %s222_s21  ;;  %p228_p5 = scmp.lt.s32.totalorder %s222_s21, %s222_s21 }
   0xc   :  { %p229_p6 = por %p228_p5, %p227_p4 }
   0xe   :  { %p230_p7 = pnand %p229_p6, %p223_p3 }
  0x10   :  { %233 = shalt.err (!%p230_p7)
}
  0x11   :  { %s285_s22 = smov 128   ;;  %s286_s23 = smov 8  }
  0x12   :  { %22 = dma.hbm_to_vmem [thread:$0]  %s366_s0, 256, %s17_s13, [#allocation4], %s285_s22, %s285_s22, %s286_s23  }
  0x13   :  { %s287_s26 = smov [#allocation6]   ;;  %s234_s30 = scalar_lea.hbm %s367_s1, 512 }
  0x14   :  { %s28_s27 = sshll.u32 %s287_s26, 4  ;;  %p235_p8 = scmp.ne.s32.totalorder %s367_s1, %s234_s30  ;;  %s29_s27 = int_to_ptr.vmem [resolvable:$true] %s28_s27 }
  0x15   :  { %p238_p9 = scmp.lt.u32.totalorder %s234_s30, %s367_s1 }
  0x17   :  { %p240_p10 = pnand %p238_p9, %p235_p8 }
  0x19   :  { %243 = shalt.err (!%p240_p10)
}
  0x1a   :  { %s244_s8 = scalar_lea.vmem %s29_s27, 512  ;;  %p249_p12 = scmp.lt.s32.totalorder %s29_s27, %s29_s27 }
  0x1b   :  { %p245_p11 = scmp.ne.s32.totalorder %s29_s27, %s244_s8  ;;  %p250_p13 = scmp.lt.s32.totalorder %s244_s8, %s244_s8 }
  0x1d   :  { %p251_p0 = por %p250_p13, %p249_p12 }
  0x1f   :  { %p252_p1 = pnand %p251_p0, %p245_p11 }
  0x21   :  { %255 = shalt.err (!%p252_p1)
}
  0x22   :  { %34 = dma.hbm_to_vmem [thread:$0]  %s367_s1, 512, %s29_s27, [#allocation7], %s285_s22, %s285_s22, %s286_s23  }
  0x23   :  { %278 = dma.done.wait [#allocation4], 256  }
  0x24   :  { %279 = vsyncadd [#allocation4], 4294967040 }
  0x25   :  { %280 = dma.done.wait [#allocation7], 512  }
  0x26   :  { %281 = vsyncadd [#allocation7], 4294966784  ;;  %vm47_vm0 = vcmask 261120   ;;  %v288_v0 = vmov 0.0   ;;  %v54_v1 = vld [vmem:[#allocation6] sm:$0xff]  ;;  %v55_v2 = vld [vmem:[#allocation6 + $0x8] sm:$0xff] }
  0x27   :  { %49 = vst.msk [vmem:[#allocation2 + $0x8] sm:$0xff] %vm47_vm0, %v288_v0  ;;  %48 = vst.msk [vmem:[#allocation2] sm:$0xff] %vm47_vm0, %v288_v0  ;;  %v56_v3 = vld [vmem:[#allocation6 + $0x10] sm:$0xff]  ;;  %v198_v4 = vpack.c.bf16 %v55_v2, %v54_v1  ;;  %v57_v5 = vld [vmem:[#allocation6 + $0x18] sm:$0xff]  ;;  %s289_s11 = smov [#allocation8]  }
  0x28   :  { %v52_v6 = vld [vmem:[#allocation3] sm:$0xff]  ;;  %v202_v7 = vpack.c.bf16 %v57_v5, %v56_v3  ;;  %v53_v8 = vld [vmem:[#allocation3 + $0x8] sm:$0xff]  ;;  %v180_v15 = vld [vmem:[%s368_s2] ss:$0 sm:$0xff]  ;;  %s165_s12 = sshll.u32 %s289_s11, 4  ;;  %s166_s12 = int_to_ptr.vmem [resolvable:$true] %s165_s12 }
  0x29   :  { %195 = vmatprep.mubr.msk.f32.mxu0 %vm47_vm0, %v52_v6  ;;  %199 = vmatprep.subr.bf16.mxu0 %v198_v4  ;;  %s256_s13 = scalar_lea.vmem %s166_s12, 256  ;;  %p261_p3 = scmp.lt.s32.totalorder %s166_s12, %s166_s12 }
  0x2a   :  { %201 = vmatpush3.bf16.msra.mxu0 %v198_v4  ;;  %p257_p2 = scmp.ne.s32.totalorder %s166_s12, %s256_s13  ;;  %p262_p4 = scmp.lt.s32.totalorder %s256_s13, %s256_s13 }
  0x2b   :  { %203 = vmatprep.subr.bf16.mxu0 %v202_v7 }
  0x2c   :  { %p263_p5 = por %p262_p4, %p261_p3 }
  0x2e   :  { %205 = vmatpush3.bf16.msra.mxu0 %v202_v7  ;;  %v51_v9 = vld [vmem:[#allocation2 + $0x8] sm:$0xff]  ;;  %v50_v10 = vld [vmem:[#allocation2] sm:$0xff]  ;;  %p264_p6 = pnand %p263_p5, %p257_p2 }
  0x31   :  { %196 = vmatmul.mubr.msk.f32.vlgmr.msra.gmra.mrb[0].mxu0 %vm47_vm0, %v53_v8 }
 0x104   :  { %v197_v11 = vpop.f32.mrb[0].mxu0 }
 0x105   :  { %v141_v12 = vadd.f32 %v197_v11, %v51_v9  ;;  %v131_v13 = vpop.f32.mrb[1].mxu0 }
 0x106   :  { %v140_v14 = vadd.f32 %v131_v13, %v50_v10 }
 0x107   :  { %143 = vst.msk [vmem:[#allocation2 + $0x8] sm:$0xff] %vm47_vm0, %v141_v12 }
 0x108   :  { %142 = vst.msk [vmem:[#allocation2] sm:$0xff] %vm47_vm0, %v140_v14 }
 0x10e   :  { %v148_v16 = vld [vmem:[#allocation2 + $0x8] sm:$0xff] }
 0x10f   :  { %v147_v17 = vld [vmem:[#allocation2] sm:$0xff]  ;;  %v157_v18 = vadd.f32 %v180_v15, %v148_v16 }
 0x110   :  { %v156_v19 = vadd.f32 %v180_v15, %v147_v17 }
 0x111   :  { %159 = vst.msk [vmem:[#allocation8 + $0x8] sm:$0xff] %vm47_vm0, %v157_v18 }
 0x112   :  { %158 = vst.msk [vmem:[#allocation8] sm:$0xff] %vm47_vm0, %v156_v19 }
 0x113   :  { %267 = shalt.err (!%p264_p6)
}
 0x114   :  { %s268_s15 = scalar_lea.hbm %s369_s3, 256 }
 0x115   :  { %p269_p7 = scmp.ne.s32.totalorder %s369_s3, %s268_s15  ;;  %p272_p8 = scmp.lt.u32.totalorder %s268_s15, %s369_s3 }
 0x117   :  { %p274_p9 = pnand %p272_p8, %p269_p7 }
 0x119   :  { %277 = shalt.err (!%p274_p9)
}
 0x11a   :  { %171 = dma.vmem_to_hbm [thread:$0]  %s166_s12, 256, %s369_s3, [#allocation5], %s285_s22, %s285_s22, %s286_s23  }
 0x11b   :  { %282 = dma.done.wait [#allocation5], 256  }
 0x11c   :  { %283 = vsyncadd [#allocation5], 4294967040 }
 0x11d   :  { %175 = vsyncpa [#allocation4], 1 }
 0x11e   :  { %176 = vsyncpa [#allocation7], 1 }
 0x11f   :  { %177 = vsyncpa [#allocation5], 1 }

</bundles_post_ra>
